<compile_context>
chip_gen: v7x
topology: tpu7x:2x2x1
jax: 0.10.0
libtpu: 0.0.40
codegen_flags: <defaults>
</compile_context>

<pallas_src>
import jax
import jax.numpy as jnp
from jax.experimental import pallas as pl
from jax.experimental.pallas import tpu as pltpu

_MIB = 1024 * 1024
_MIN_TOTAL_BLOCKS = 4  # keep both v7x TensorCores busy; cheap on v5e/v6e too


# ----------------------------------------------------------------------------
# Kernels
# ----------------------------------------------------------------------------
def _sa_kernel_planes(x_ref, w_ref, b_ref, o_ref):
    """Planes layout: x_ref/o_ref (1, C, S_t, 128); w_ref (C,) SMEM; b_ref (1,) SMEM.

    Channel reduction = C scalar-vector multiply-adds over full (S_t, 128)
    vreg planes (pure VPU, no XLU).  Logits accumulate in f32; the output
    multiply re-reads the native-dtype block (no large f32 temporary)."""
    C = x_ref.shape[1]
    logits = x_ref[0, 0].astype(jnp.float32) * w_ref[0]
    for c in range(1, C):
        logits = logits + x_ref[0, c].astype(jnp.float32) * w_ref[c]
    logits = logits + b_ref[0]
    attn = jax.nn.sigmoid(logits).astype(o_ref.dtype)          # (S_t, 128)
    o_ref[0] = x_ref[0] * attn[None, :, :]                     # native-dtype mul


def _sa_kernel_rows(x_ref, w_ref, b_ref, o_ref):
    """Rows layout (general C): x_ref/o_ref (1, C, TL); w_ref (C, 1) VMEM."""
    x = x_ref[0]                                               # native (C, TL)
    w = w_ref[...].astype(jnp.float32)                         # (C, 1)
    logits = jnp.sum(x.astype(jnp.float32) * w, axis=0, keepdims=True) + b_ref[0]
    attn = jax.nn.sigmoid(logits)                              # (1, TL)
    o_ref[0] = x * attn.astype(x.dtype)                        # native-dtype mul


# ----------------------------------------------------------------------------
# Sizing helpers
# ----------------------------------------------------------------------------
def _vmem_and_block_budget():
    """Scoped VMEM limit and raw per-block byte budget, per chip generation.

    Accounting: raw block * (2 arrays: in+out) * (2 buffers) must stay well
    under the scoped limit, which itself stays well under physical VMEM."""
    physical = None
    try:
        info = pltpu.get_tpu_info()
        for name in ("vmem_capacity_bytes", "vmem_bytes", "vmem_size_bytes"):
            v = getattr(info, name, None)
            if isinstance(v, int) and v > 0:
                physical = v
                break
    except Exception:
        physical = None
    if physical is None:
        physical = 64 * _MIB                    # assume smallest (v7x-like)

    if physical >= 128 * _MIB:                  # v5e / v6e
        vmem_limit = 64 * _MIB
        raw_budget = 8 * _MIB                   # 4x (in+out, double-buffered) = 32 MiB
    else:                                       # v7x (64 MiB physical per TC)
        vmem_limit = min(40 * _MIB, max(24 * _MIB, physical // 2))
        raw_budget = 2 * _MIB                   # 4x = 8 MiB, big headroom
    return vmem_limit, raw_budget


def _choose_s_tile(S, max_s, align, min_spatial_blocks):
    """Tile for the sublane axis of an (S, 128) plane: multiple of `align`
    (no sublane padding) dividing S, or the full axis."""
    if S < align or S % align != 0:
        return S
    cap = max(align, min(S, (max_s // align) * align))
    if min_spatial_blocks > 1:
        per = (S // min_spatial_blocks) // align * align
        if per >= align:
            cap = min(cap, per)
    for cand in range(cap, align - 1, -align):
        if S % cand == 0:
            return cand
    return align


def _choose_tl(L, max_tl, min_spatial_blocks):
    """Lane-axis tile: multiple of 128 (prefer divisor of L) or the full axis."""
    max_tl = max(128, max_tl)
    if L % 128 != 0:
        return L if L <= max_tl else (max_tl // 128) * 128
    cap = max(128, min(L, (max_tl // 128) * 128))
    if min_spatial_blocks > 1:
        per = (L // min_spatial_blocks) // 128 * 128
        if per >= 128:
            cap = min(cap, per)
    for cand in range(cap, 127, -128):
        if L % cand == 0:
            return cand
    return cap


# ----------------------------------------------------------------------------
# Wrapper
# ----------------------------------------------------------------------------
def spatial_attention(x_nchw, weight, bias):
    """x_nchw: (B, C, H, W); weight: (1, C, 1, 1); bias: (1,)."""
    B, C, H, W = x_nchw.shape
    L = H * W
    dtype = x_nchw.dtype
    itemsize = jnp.dtype(dtype).itemsize
    pack = max(8, 32 // itemsize)               # sublanes per 32-bit row group

    vmem_limit, raw_budget = _vmem_and_block_budget()
    min_spatial_blocks = -(-_MIN_TOTAL_BLOCKS // B)   # ceil(4 / B)

    w_flat = weight.reshape(C).astype(jnp.float32)
    b_flat = bias.reshape(1).astype(jnp.float32)

    compiler_params = pltpu.CompilerParams(
        dimension_semantics=("parallel", "parallel"),
        vmem_limit_bytes=vmem_limit,
    )

    if C <= pack and L % 128 == 0:
        # ---- planes layout: (B, C, S, 128), full sublane utilization -------
        S = L // 128
        x4 = x_nchw.reshape(B, C, S, 128)       # free view
        max_s = max(1, raw_budget // (C * 128 * itemsize))
        s_tile = _choose_s_tile(S, max_s, pack, min_spatial_blocks)
        grid = (B, S // s_tile)

        out = pl.pallas_call(
            _sa_kernel_planes,
            out_shape=jax.ShapeDtypeStruct((B, C, S, 128), dtype),
            grid=grid,
            in_specs=[
                pl.BlockSpec((1, C, s_tile, 128), lambda b, j: (b, 0, j, 0)),
                pl.BlockSpec(memory_space=pltpu.MemorySpace.SMEM),   # weight (C,)
                pl.BlockSpec(memory_space=pltpu.MemorySpace.SMEM),   # bias  (1,)
            ],
            out_specs=pl.BlockSpec((1, C, s_tile, 128), lambda b, j: (b, 0, j, 0)),
            compiler_params=compiler_params,
        )(x4, w_flat, b_flat)
        return out.reshape(B, C, H, W)

    # ---- rows layout (general C / ragged L): (B, C, L) ----------------------
    x3 = x_nchw.reshape(B, C, L)                # free view
    c_pad = -(-C // pack) * pack                # sublane-padded channel count
    max_tl = max(1, raw_budget // (c_pad * itemsize))
    tl = _choose_tl(L, max_tl, min_spatial_blocks)
    grid = (B, pl.cdiv(L, tl))

    w2d = weight.reshape(C, 1).astype(jnp.float32)

    out = pl.pallas_call(
        _sa_kernel_rows,
        out_shape=jax.ShapeDtypeStruct((B, C, L), dtype),
        grid=grid,
        in_specs=[
            pl.BlockSpec((1, C, tl), lambda b, j: (b, 0, j)),
            pl.BlockSpec((C, 1), lambda b, j: (0, 0)),               # weight, resident
            pl.BlockSpec(memory_space=pltpu.MemorySpace.SMEM),       # bias (1,)
        ],
        out_specs=pl.BlockSpec((1, C, tl), lambda b, j: (b, 0, j)),
        compiler_params=compiler_params,
    )(x3, w2d, b_flat)
    return out.reshape(B, C, H, W)


def spatial_attention_ref(x_nchw, weight, bias):
    """Pure-JAX reference matching the PyTorch forward exactly."""
    w = weight.reshape(1, -1, 1, 1)
    logits = jnp.sum(x_nchw * w, axis=1, keepdims=True) + bias.reshape(1, 1, 1, 1)
    attn = jax.nn.sigmoid(logits)
    return x_nchw * attn


if __name__ == "__main__":
    key = jax.random.PRNGKey(0)
    kx, kw, kb = jax.random.split(key, 3)

    # Primary case (planes path): small C, L % 128 == 0.
    B, C, H, W = 2, 4, 16, 16
    x = jax.random.normal(kx, (B, C, H, W), dtype=jnp.float32)
    weight = jax.random.normal(kw, (1, C, 1, 1), dtype=jnp.float32) * 0.1
    bias = jax.random.normal(kb, (1,), dtype=jnp.float32) * 0.1

    out = spatial_attention(x, weight, bias)
    out = jax.block_until_ready(out)
    ref = spatial_attention_ref(x, weight, bias)
    assert out.shape == (B, C, H, W)
    assert jnp.allclose(out, ref, atol=1e-5, rtol=1e-5), "planes path mismatch"

    # Secondary case (rows path): larger channel count.
    C2 = 16
    x2 = jax.random.normal(kx, (B, C2, H, W), dtype=jnp.float32)
    weight2 = jax.random.normal(kw, (1, C2, 1, 1), dtype=jnp.float32) * 0.1
    out2 = spatial_attention(x2, weight2, bias)
    out2 = jax.block_until_ready(out2)
    ref2 = spatial_attention_ref(x2, weight2, bias)
    assert jnp.allclose(out2, ref2, atol=1e-5, rtol=1e-5), "rows path mismatch"

    print("KERNEL_OK")
</pallas_src>

<mosaic_0001>
module attributes {stable_mosaic.version = 11 : i64} {
  func.func @_sa_kernel_planes(%arg0: i32, %arg1: i32, %arg2: memref<1x4x2x128xf32, #tpu.memory_space<vmem>>, %arg3: memref<4xf32, #tpu.memory_space<smem>>, %arg4: memref<1xf32, #tpu.memory_space<smem>>, %arg5: memref<1x4x2x128xf32, #tpu.memory_space<vmem>>) attributes {dimension_semantics = [#tpu.dimension_semantics<parallel>, #tpu.dimension_semantics<parallel>], iteration_bounds = array<i64: 2, 1>, scalar_prefetch = 0 : i64, scratch_operands = 0 : i64, tpu.core_type = #tpu.core_type<tc>, window_params = [{transform_indices = @transform_0, window_bounds = array<i64: 1, 4, 2, 128>}, {transform_indices = @transform_1, window_bounds = array<i64: 4>}, {transform_indices = @transform_2, window_bounds = array<i64: 1>}, {transform_indices = @transform_3, window_bounds = array<i64: 1, 4, 2, 128>}]} {
    %c0 = arith.constant 0 : index
    %c0_0 = arith.constant 0 : index
    %c0_1 = arith.constant 0 : index
    %c0_2 = arith.constant 0 : index
    %0 = vector.load %arg2[%c0, %c0_0, %c0_1, %c0_2] : memref<1x4x2x128xf32, #tpu.memory_space<vmem>>, vector<1x1x2x128xf32>
    %1 = vector.shape_cast %0 : vector<1x1x2x128xf32> to vector<2x128xf32>
    %c0_3 = arith.constant 0 : index
    %2 = memref.load %arg3[%c0_3] : memref<4xf32, #tpu.memory_space<smem>>
    %3 = vector.broadcast %2 : f32 to vector<2x128xf32>
    %4 = arith.mulf %1, %3 : vector<2x128xf32>
    %c0_4 = arith.constant 0 : index
    %c1 = arith.constant 1 : index
    %c0_5 = arith.constant 0 : index
    %c0_6 = arith.constant 0 : index
    %5 = vector.load %arg2[%c0_4, %c1, %c0_5, %c0_6] : memref<1x4x2x128xf32, #tpu.memory_space<vmem>>, vector<1x1x2x128xf32>
    %6 = vector.shape_cast %5 : vector<1x1x2x128xf32> to vector<2x128xf32>
    %c1_7 = arith.constant 1 : index
    %7 = memref.load %arg3[%c1_7] : memref<4xf32, #tpu.memory_space<smem>>
    %8 = vector.broadcast %7 : f32 to vector<2x128xf32>
    %9 = arith.mulf %6, %8 : vector<2x128xf32>
    %10 = arith.addf %4, %9 : vector<2x128xf32>
    %c0_8 = arith.constant 0 : index
    %c2 = arith.constant 2 : index
    %c0_9 = arith.constant 0 : index
    %c0_10 = arith.constant 0 : index
    %11 = vector.load %arg2[%c0_8, %c2, %c0_9, %c0_10] : memref<1x4x2x128xf32, #tpu.memory_space<vmem>>, vector<1x1x2x128xf32>
    %12 = vector.shape_cast %11 : vector<1x1x2x128xf32> to vector<2x128xf32>
    %c2_11 = arith.constant 2 : index
    %13 = memref.load %arg3[%c2_11] : memref<4xf32, #tpu.memory_space<smem>>
    %14 = vector.broadcast %13 : f32 to vector<2x128xf32>
    %15 = arith.mulf %12, %14 : vector<2x128xf32>
    %16 = arith.addf %10, %15 : vector<2x128xf32>
    %c0_12 = arith.constant 0 : index
    %c3 = arith.constant 3 : index
    %c0_13 = arith.constant 0 : index
    %c0_14 = arith.constant 0 : index
    %17 = vector.load %arg2[%c0_12, %c3, %c0_13, %c0_14] : memref<1x4x2x128xf32, #tpu.memory_space<vmem>>, vector<1x1x2x128xf32>
    %18 = vector.shape_cast %17 : vector<1x1x2x128xf32> to vector<2x128xf32>
    %c3_15 = arith.constant 3 : index
    %19 = memref.load %arg3[%c3_15] : memref<4xf32, #tpu.memory_space<smem>>
    %20 = vector.broadcast %19 : f32 to vector<2x128xf32>
    %21 = arith.mulf %18, %20 : vector<2x128xf32>
    %22 = arith.addf %16, %21 : vector<2x128xf32>
    %c0_16 = arith.constant 0 : index
    %23 = memref.load %arg4[%c0_16] : memref<1xf32, #tpu.memory_space<smem>>
    %24 = vector.broadcast %23 : f32 to vector<2x128xf32>
    %25 = arith.addf %22, %24 : vector<2x128xf32>
    %26 = arith.negf %25 : vector<2x128xf32>
    %27 = math.exp %26 : vector<2x128xf32>
    %cst = arith.constant 1.000000e+00 : f32
    %28 = vector.broadcast %cst : f32 to vector<2x128xf32>
    %29 = arith.addf %28, %27 : vector<2x128xf32>
    %30 = arith.divf %28, %29 : vector<2x128xf32>
    %c0_17 = arith.constant 0 : index
    %c0_18 = arith.constant 0 : index
    %c0_19 = arith.constant 0 : index
    %c0_20 = arith.constant 0 : index
    %31 = vector.load %arg2[%c0_17, %c0_18, %c0_19, %c0_20] : memref<1x4x2x128xf32, #tpu.memory_space<vmem>>, vector<1x4x2x128xf32>
    %32 = vector.shape_cast %31 : vector<1x4x2x128xf32> to vector<4x2x128xf32>
    %33 = vector.shape_cast %30 : vector<2x128xf32> to vector<1x2x128xf32>
    %34 = vector.broadcast %33 : vector<1x2x128xf32> to vector<4x2x128xf32>
    %35 = arith.mulf %32, %34 : vector<4x2x128xf32>
    %c0_21 = arith.constant 0 : index
    %c0_22 = arith.constant 0 : index
    %c0_23 = arith.constant 0 : index
    %c0_24 = arith.constant 0 : index
    %36 = vector.load %arg5[%c0_21, %c0_22, %c0_23, %c0_24] : memref<1x4x2x128xf32, #tpu.memory_space<vmem>>, vector<1x4x2x128xf32>
    %37 = vector.shape_cast %36 : vector<1x4x2x128xf32> to vector<4x2x128xf32>
    %38 = vector.shape_cast %35 : vector<4x2x128xf32> to vector<1x4x2x128xf32>
    tpu.vector_store %arg5[%c0_21, %c0_22, %c0_23, %c0_24], %38 {strides = array<i32>} : memref<1x4x2x128xf32, #tpu.memory_space<vmem>>, vector<1x4x2x128xf32>,
    return
  }
  func.func @transform_0(%arg0: i32, %arg1: i32) -> (i32, i32, i32, i32) {
    %c0_i32 = arith.constant 0 : i32
    %c0_i32_0 = arith.constant 0 : i32
    %c0_i32_1 = arith.constant 0 : i32
    return %arg0, %c0_i32, %arg1, %c0_i32_0 : i32, i32, i32, i32
  }
  func.func @transform_1(%arg0: i32, %arg1: i32) -> i32 {
    %c0_i32 = arith.constant 0 : i32
    %c0_i32_0 = arith.constant 0 : i32
    return %c0_i32 : i32
  }
  func.func @transform_2(%arg0: i32, %arg1: i32) -> i32 {
    %c0_i32 = arith.constant 0 : i32
    %c0_i32_0 = arith.constant 0 : i32
    return %c0_i32 : i32
  }
  func.func @transform_3(%arg0: i32, %arg1: i32) -> (i32, i32, i32, i32) {
    %c0_i32 = arith.constant 0 : i32
    %c0_i32_0 = arith.constant 0 : i32
    %c0_i32_1 = arith.constant 0 : i32
    return %arg0, %c0_i32, %arg1, %c0_i32_0 : i32, i32, i32, i32
  }
}

</mosaic_0001>

<bundles_post_ra>
// kernel: tpu_custom_call.1
= control target key start
LH: loop header
LB: loop body
LE: loop exit
PB: predicated region body
PF: predicated region fallthrough
CT: control target
= control target key end

     0   :  { %s872_s0 = inlined_call_operand.hbm [shape: f32[2,4,2,128], index: 0, kind: input, shape index: {}]   ;;  %s873_s1 = inlined_call_operand.vmem [shape: f32[4], index: 1, kind: input, shape index: {}]   ;;  %s874_s2 = inlined_call_operand.<no memory space> [shape: f32[1], index: 2, kind: input, shape index: {}]   ;;  %s875_s3 = inlined_call_operand.hbm [shape: f32[2,4,2,128], index: 3, kind: output, shape index: {}]  }
   0x1   :  { %8 = sst [smem:[#allocation2]] %s874_s2 }
   0x2   :  { %9 = vsyncpa [#allocation4], 0 }
   0x3   :  { %11 = vsyncpa [#allocation4 + $0x1], 0 }
   0x4   :  { %12 = vsyncpa [#allocation6], 0 }
   0x5   :  { %13 = vsyncpa [#allocation5], 0 }
   0x6   :  { %15 = vsyncpa [#allocation5 + $0x1], 0  ;;  %s646_s14 = smov 0   ;;  %s648_s15 = smov 0  }
   0x7   :  { %s650_s16 = smov 0   ;;  %s652_s17 = smov 0  }
   0x8   :  { %s654_s18 = smov 0   ;;  %s656_s19 = smov 0  }
   0x9 LB: > { %s376_s2 = sadd.s32 4294967295, %s614_s19   ;;  %s377_s20 = sadd.s32 4294967294, %s614_s19   ;;  %s614_s19 = sphi %s656_s19, %s21_s19   ;;  %s610_s18 = sphi %s654_s18, %s898_s18   ;;  %s606_s17 = sphi %s652_s17, %s897_s17   ;;  %s602_s16 = sphi %s650_s16, %s896_s16   ;;  %s598_s15 = sphi %s648_s15, %s895_s15   ;;  %s594_s14 = sphi %s646_s14, %s894_s14  }
   0xa   : > { %s42_s21 = sadd.s32 1, %s602_s16  ;;  %p49_p0 = scmp.ne.s32.totalorder %s602_s16, %s598_s15 }
   0xb   : > { %p50_p1 = scmp.eq.s32.totalorder %s614_s19, 0  ;;  %p55_p2 = scmp.ne.s32.totalorder %s598_s15, %s594_s14 }
   0xc   : > { %p684_p3 = scmp.eq.s32.totalorder %s376_s2, 0  ;;  %p123_p4 = scmp.eq.s32.totalorder %s376_s2, 1 }
   0xd   : > { %p688_p5 = por %p50_p1, %p49_p0  ;;  %p129_p6 = scmp.eq.s32.totalorder %s377_s20, 1 }
   0xe   : > { %s880_s22 = scalar_select %p684_p3, 1, 0 }
   0xf   : > { %p694_p7 = por %p684_p3, %p55_p2  ;;  %p698_p8 = por %p123_p4, %p49_p0 }
  0x10   : > { %p702_p9 = por %p129_p6, %p55_p2  ;;  %p378_p10 = scmp.ge.s32.totalorder %s614_s19, 1 }
  0x11   : > { %s882_s24 = scalar_select %p694_p7, 1, 0 }
  0x12   : > { %s883_s25 = scalar_select %p698_p8, 1, 0 }
  0x13   : > { %s884_s26 = scalar_select %p702_p9, 1, 0 }
  0x14   : > { %p136_p11 = scmp.lt.s32.totalorder %s614_s19, 3  ;;  %s149_s29 = sshll.u32 %s873_s1, 4  ;;  %s150_s29 = int_to_ptr.vmem [resolvable:$true] %s149_s29 }
  0x15   : > { %p423_p0 = scmp.lt.s32.totalorder %s614_s19, 2  ;;  %s33_s6 = sadd.s32 1, %s610_s18 }
  0x16   : > { %p711_p12 = pnand %p378_p10, %p136_p11  ;;  %p732_p6 = scmp.ge.s32.totalorder %s33_s6, 2 }
  0x17   : > { %p721_p2 = pnand %p423_p0, %p688_p5  ;;  %s163_s8 = sand.u32 1, %s602_s16  }
  0x18   : > { %p410_p1 = pneg %p711_p12  ;;  %s483_s9 = scalar_lea.vmem %s150_s29, 16 }
  0x19   : > { %p484_p10 = scmp.ne.s32.totalorder %s150_s29, %s483_s9  ;;  %p491_p13 = scmp.lt.s32.totalorder %s150_s29, %s150_s29 }
  0x1a   : > { %p727_p4 = pnand %p410_p1, %p684_p3  ;;  %p492_p9 = scmp.lt.s32.totalorder %s483_s9, %s483_s9 }
  0x1c   : > { %p485_p11 = pneg %p727_p4  ;;  %p493_p8 = por %p492_p9, %p491_p13 }
  0x1e   : > { %p486_p5 = pnand %p485_p11, %p484_p10 }
  0x20   : > { %p487_p0 = pneg %p486_p5 }
  0x22   : > { %p494_p1 = pnand %p493_p8, %p487_p0 }
  0x24   : > { %497 = shalt.err (!%p494_p1)
}
  0x25   : > { %s616_s10 = smov [#allocation7]   ;;  %s900_s6 = smov (%p732_p6, %s33_s6), 0 }
  0x26   : > { %413 = dma.vmem_to_smem (!%p727_p4), %s150_s29, 16, %s616_s10, [#allocation6]  }
  0x27   : > { %s381_s11 = sshll.u32 %s163_s8, 3  ;;  %s37_s12 = ssub.s32 %s610_s18, %s900_s6 }
  0x28   : > { %p40_p9 = scmp.eq.s32.totalorder %s37_s12, 0  ;;  %s400_s13 = sshll.u32 %s610_s18, 7 }
  0x29   : > { %s751_s23 = scalar_lea.hbm %s872_s0, %s400_s13  ;;  %s167_s27 = scalar_lea.vmem [#allocation3], %s381_s11 }
  0x2a   : > { %s175_s28 = sshll.u32 %s167_s27, 4  ;;  %s760_s5 = scalar_lea.sflag [#allocation4], %s163_s8  ;;  %s758_s28 = int_to_ptr.vmem [resolvable:$true] %s175_s28 }
  0x2b   : > { %s756_s29 = scalar_select %p40_p9, %s602_s16, %s42_s21  }
  0x2c   : > { %s498_s7 = scalar_lea.hbm %s751_s23, 128  ;;  %p500_p13 = pneg %p721_p2 }
  0x2d   : > { %p499_p8 = scmp.ne.s32.totalorder %s751_s23, %s498_s7  ;;  %s503_s11 = scalar_lea.hbm %s872_s0, 256 }
  0x2e   : > { %p504_p10 = scmp.lt.u32.totalorder %s751_s23, %s872_s0  ;;  %p505_p11 = scmp.lt.u32.totalorder %s503_s11, %s498_s7 }
  0x2f   : > { %p501_p4 = pnand %p500_p13, %p499_p8  ;;  %p507_p0 = scmp.lt.u32.totalorder %s498_s7, %s751_s23 }
  0x30   : > { %p506_p5 = por %p505_p11, %p504_p10 }
  0x31   : > { %p502_p6 = pneg %p501_p4 }
  0x32   : > { %p508_p1 = por %p507_p0, %p506_p5 }
  0x34   : > { %p509_p9 = pnand %p508_p1, %p502_p6 }
  0x36   : > { %512 = shalt.err (!%p509_p9)
}
  0x37   : > { %s513_s21 = scalar_lea.vmem %s758_s28, 128  ;;  %s617_s8 = smov [#allocation3]  }
  0x38   : > { %p514_p8 = scmp.ne.s32.totalorder %s758_s28, %s513_s21  ;;  %s518_s2 = sshll.u32 %s617_s8, 4  ;;  %s519_s2 = int_to_ptr.vmem [resolvable:$false] %s518_s2 }
  0x39   : > { %s520_s20 = scalar_lea.vmem %s519_s2, 256  ;;  %p521_p7 = scmp.lt.s32.totalorder %s758_s28, %s519_s2 }
  0x3a   : > { %p516_p4 = pnand %p514_p8, %p500_p13  ;;  %p522_p10 = scmp.lt.s32.totalorder %s520_s20, %s513_s21 }
  0x3c   : > { %p517_p3 = pneg %p516_p4  ;;  %p523_p11 = por %p522_p10, %p521_p7 }
  0x3e   : > { %p524_p5 = pnand %p523_p11, %p517_p3 }
  0x40   : > { %527 = shalt.err (!%p524_p5)
}
  0x41   : > { %s618_s27 = smov 32   ;;  %s619_s7 = smov 2  }
  0x42   : > { %417 = dma.hbm_to_vmem [thread:$0]  (!%p721_p2), %s751_s23, 128, %s758_s28, %s760_s5, %s618_s27, %s618_s27, %s619_s7  }
  0x43   : > { %187 = sbr.rel (%p711_p12) target bundleno = 141 (0x8d), region = 32  ;;  %s791_s9 = sand.u32 (!%p711_p12), 1, %s598_s15  }
  0x44   : > { %s385_s10 = sshll.u32 (!%p711_p12), %s791_s9, 3  ;;  %s190_s11 = scalar_lea.sflag (!%p711_p12), [#allocation4], %s791_s9 }
  0x45   : > { %s797_s12 = scalar_lea.vmem (!%p711_p12), [#allocation3], %s385_s10  ;;  %p889_p3 = scmp.ne.s32.totalorder (!%p711_p12), %s882_s24, 0 }
  0x4a   : > { %581 = dma.done.wait (%p889_p3), %s190_s11, 128  }
  0x4b   : > { %583 = vsyncadd (%p889_p3), %s190_s11, 4294967168  ;;  %p890_p7 = scmp.ne.s32.totalorder %s880_s22, 0 }
  0x4d   : > { %585 = dma.done.wait (%p890_p7), [#allocation6], 16  }
  0x4e   : > { %587 = vsyncadd (%p890_p7), [#allocation6], 4294967280 }
  0x4f   : > { %202 = sfence }
  0x50   : > { %s222_s30 = sld [smem:[#allocation7]]  ;;  %s389_s4 = sld [smem:[#allocation7 + $0x1]]  ;;  %v221_v0 = vld [vmem:[%s797_s12] sm:$0x3]  ;;  %v388_v1 = vld [vmem:[%s797_s12 + $0x2] sm:$0x3] }
  0x51   : > { %s391_s23 = sld [smem:[#allocation7 + $0x2]]  ;;  %s393_s28 = sld [smem:[#allocation7 + $0x3]]  ;;  %v390_v3 = vld [vmem:[%s797_s12 + $0x4] sm:$0x3]  ;;  %v392_v6 = vld [vmem:[%s797_s12 + $0x6] sm:$0x3] }
  0x52   : > { %s243_s5 = sld [smem:[#allocation2]]  ;;  %s220_s22 = scalar_lea.vmem [#allocation8], %s385_s10  ;;  %v252_v20 = vld [vmem:[%s797_s12] sm:$0x3]  ;;  %v253_v21 = vld [vmem:[%s797_s12 + $0x2] sm:$0x3] }
  0x53   : > { %s279_s24 = sshll.u32 %s220_s22, 4  ;;  %s401_s13 = sshll.u32 %s606_s17, 7  ;;  %v254_v22 = vld [vmem:[%s797_s12 + $0x4] sm:$0x3]  ;;  %v255_v23 = vld [vmem:[%s797_s12 + $0x6] sm:$0x3]  ;;  %s818_s24 = int_to_ptr.vmem [resolvable:$true] %s279_s24 }
  0x54   : > { %s823_s2 = scalar_lea.hbm %s875_s3, %s401_s13  ;;  %s265_s17 = scalar_lea.sflag [#allocation5], %s791_s9 }
  0x55   : > { %s528_s20 = scalar_lea.vmem %s818_s24, 128  ;;  %p891_p2 = scmp.ne.s32.totalorder %s883_s25, 0 }
  0x56   : > { %v223_v2 = vstv %s222_s30  ;;  %v228_v5 = vstv %s389_s4  ;;  %p529_p12 = scmp.ne.s32.totalorder %s818_s24, %s528_s20  ;;  %s620_s27 = smov [#allocation8]  }
  0x57   : > { %v224_v4 = vmul.f32 %v223_v2, %v221_v0  ;;  %v229_v7 = vmul.f32 %v388_v1, %v228_v5  ;;  %v234_v8 = vstv %s391_s23  ;;  %v240_v9 = vstv %s393_s28  ;;  %s532_s7 = sshll.u32 %s620_s27, 4  ;;  %s533_s7 = int_to_ptr.vmem [resolvable:$false] %s532_s7 }
  0x58   : > { %v235_v10 = vmul.f32 %v390_v3, %v234_v8  ;;  %v241_v12 = vmul.f32 %v392_v6, %v240_v9  ;;  %v244_v14 = vstv %s243_s5  ;;  %p530_p13 = pnand %p529_p12, %p891_p2  ;;  %s534_s10 = scalar_lea.vmem %s533_s7, 256 }
  0x59   : > { %v230_v11 = vadd.f32 %v229_v7, %v224_v4  ;;  %p535_p0 = scmp.lt.s32.totalorder %s818_s24, %s533_s7  ;;  %p536_p1 = scmp.lt.s32.totalorder %s534_s10, %s528_s20 }
  0x5a   : > { %p531_p6 = pneg %p530_p13 }
  0x5b   : > { %v236_v13 = vadd.f32 %v235_v10, %v230_v11  ;;  %p537_p9 = por %p536_p1, %p535_p0 }
  0x5d   : > { %v242_v15 = vadd.f32 %v241_v12, %v236_v13  ;;  %p538_p8 = pnand %p537_p9, %p531_p6 }
  0x5f   : > { %v245_v16 = vadd.f32 %v244_v14, %v242_v15 }
  0x61   : > { %v394_v17 = vmul.f32 -1.442695, %v245_v16 }
  0x63   : > { %479 = vpow2.f32 %v394_v17 }
  0x6d   : > { %v480_v18 = vpop.eup %479 }
  0x6e   : > { %v249_v19 = vadd.f32 1.0, %v480_v18 }
  0x70   : > { %481 = vrcp.f32 %v249_v19 }
  0x7a   : > { %v482_v24 = vpop.eup %481 }
  0x7b   : > { %v256_v25 = vmul.f32 %v482_v24, %v252_v20  ;;  %v257_v26 = vmul.f32 %v482_v24, %v253_v21  ;;  %v258_v27 = vmul.f32 %v482_v24, %v254_v22  ;;  %v259_v28 = vmul.f32 %v482_v24, %v255_v23 }
  0x7d   : > { %260 = vst [vmem:[%s220_s22] sm:$0x3] %v256_v25  ;;  %261 = vst [vmem:[%s220_s22 + $0x2] sm:$0x3] %v257_v26 }
  0x7e   : > { %262 = vst [vmem:[%s220_s22 + $0x4] sm:$0x3] %v258_v27  ;;  %263 = vst [vmem:[%s220_s22 + $0x6] sm:$0x3] %v259_v28 }
  0x7f   : > { %541 = shalt.err (!%p538_p8)
}
  0x80   : > { %s542_s11 = scalar_lea.hbm %s823_s2, 128  ;;  %s546_s4 = scalar_lea.hbm %s875_s3, 256 }
  0x81   : > { %p543_p4 = scmp.ne.s32.totalorder %s823_s2, %s542_s11  ;;  %p547_p5 = scmp.lt.u32.totalorder %s823_s2, %s875_s3 }
  0x82   : > { %p548_p3 = scmp.lt.u32.totalorder %s546_s4, %s542_s11  ;;  %p550_p12 = scmp.lt.u32.totalorder %s542_s11, %s823_s2 }
  0x83   : > { %p544_p10 = pnand %p543_p4, %p891_p2 }
  0x84   : > { %p549_p7 = por %p548_p3, %p547_p5 }
  0x85   : > { %p545_p11 = pneg %p544_p10 }
  0x86   : > { %p551_p13 = por %p550_p12, %p549_p7 }
  0x88   : > { %p552_p6 = pnand %p551_p13, %p545_p11 }
  0x8a   : > { %555 = shalt.err (!%p552_p6)
}
  0x8b   : > { %s621_s5 = smov 32   ;;  %s622_s22 = smov 2  }
  0x8c   : > { %408 = dma.vmem_to_hbm [thread:$0]  (%p891_p2), %s818_s24, 128, %s823_s2, %s265_s17, %s621_s5, %s621_s5, %s622_s22  }
  0x8d PF: > { %s294_s13 = sand.u32 1, %s594_s14   ;;  %p892_p0 = scmp.ne.s32.totalorder %s884_s26, 0 }
  0x8e   : > { %p893_p1 = scmp.ge.s32.totalorder %s614_s19, 2  ;;  %s295_s21 = scalar_lea.sflag [#allocation5], %s294_s13 }
  0x90   : > { %p419_p9 = pnand %p893_p1, %p892_p0 }
  0x92   : > { %589 = dma.done.wait (!%p419_p9), %s295_s21, 128  }
  0x93   : > { %591 = vsyncadd (!%p419_p9), %s295_s21, 4294967168  ;;  %s21_s19 = sadd.s32 1, %s614_s19   ;;  %s894_s14 = smov %s598_s15 }
  0x94   : > { %p18_p8 = scmp.ge.s32.totalorder %s21_s19, 4   ;;  %s895_s15 = smov %s602_s16 }
  0x95   : > { %s896_s16 = smov %s756_s29  ;;  %s897_s17 = smov %s610_s18 }
  0x96   : > { %s898_s18 = smov %s900_s6  ;;  %20 = sbr.rel (!%p18_p8) target bundleno = 9 (0x9), region = 85 }
  0x9d   :  { %300 = vsyncpa [#allocation4], 1 }
  0x9e   :  { %302 = vsyncpa [#allocation4 + $0x1], 1 }
  0x9f   :  { %303 = vsyncpa [#allocation5], 1 }
  0xa0   :  { %305 = vsyncpa [#allocation5 + $0x1], 1 }
  0xa1   :  { %306 = vsyncpa [#allocation6], 1 }
  0xa2   :  { %308 = vsyncpa [#allocation6 + $0x1], 1 }

</bundles_post_ra>
